<compile_context>
chip_gen: v7x
topology: tpu7x:2x2x1
jax: 0.10.0
libtpu: 0.0.40
codegen_flags: <defaults>
</compile_context>

<pallas_src>
import functools
import math

import jax
import jax.numpy as jnp
from jax.experimental import pallas as pl
from jax.experimental.pallas import tpu as pltpu

LANES = 128  # TPU vreg lane width.


def _round_up(x, m):
    return ((x + m - 1) // m) * m


def _imgs_per_step(n, cap=8):
    """Images per grid step: as many as possible (amortize per-step overhead
    on single-TC v5e/v6e) while keeping the grid >= 2 steps when n >= 2 so
    both v7x TensorCores get work."""
    best = 1
    for c in range(1, min(cap, n) + 1):
        if n % c == 0 and n // c >= min(2, n):
            best = c
    return best


# ----------------------------------------------------------------------------
# Fused Pallas kernel: one grid step processes `imgs` whole images.
# ----------------------------------------------------------------------------
def _fused_kernel(*refs, want_seg, want_disc, want_feats, imgs, hw, inv_hw):
    """refs = patches, w1, b12, [w2], [wd], [seg_out], [dom_out], [feat_out]."""
    it = iter(refs)
    p_ref = next(it)                       # (imgs*hw, K_pad) bf16 im2col patches
    w1_ref = next(it)                      # (K_pad, LANES)   bf16 fused conv weights
    b_ref = next(it)                       # (2, LANES) f32: row0 = b1, row1 = b2
    w2_ref = next(it) if want_seg else None    # (LANES, LANES) bf16 1x1 seg head
    wd_ref = next(it) if want_disc else None   # (2, LANES) f32: row0 = disc w, row1 = disc b
    seg_ref = next(it) if want_seg else None
    dom_ref = next(it) if want_disc else None
    feat_ref = next(it) if want_feats else None

    # Fused encoder + discriminator 3x3 conv on the SHARED im2col patches:
    # bf16 MXU matmul, f32 accumulation, bias + ReLU in f32.  The
    # (imgs*hw, 128) feature tile stays in vregs/VMEM for the whole epilogue.
    feats = jnp.dot(p_ref[...], w1_ref[...], preferred_element_type=jnp.float32)
    feats = jnp.maximum(feats + b_ref[0:1, :], 0.0)        # (imgs*hw, 128) f32

    if want_seg:
        # 1x1 conv head (lanes >= num_classes are zero columns of w2).
        seg = jnp.dot(feats.astype(jnp.bfloat16), w2_ref[...],
                      preferred_element_type=jnp.float32)
        seg_ref[...] = (seg + b_ref[1:2, :]).astype(seg_ref.dtype)

    if want_disc:
        # Global average pool per image + tiny linear head, all on the
        # VPU/XLU (no extra MXU push, no broadcast matmul).
        if imgs == 1:
            pooled = jnp.sum(feats, axis=0, keepdims=True) * inv_hw      # (1, 128)
        else:
            pooled = jnp.sum(feats.reshape(imgs, hw, LANES), axis=1) * inv_hw
        dom = jnp.sum(pooled * wd_ref[0:1, :], axis=-1, keepdims=True)   # (imgs, 1)
        dom_row = jnp.broadcast_to(dom, (imgs, LANES)) + wd_ref[1:2, :]
        dom_ref[...] = dom_row.reshape(1, imgs, LANES)

    if want_feats:
        feat_ref[...] = feats.astype(feat_ref.dtype)


# ----------------------------------------------------------------------------
# JAX glue: NHWC im2col (unpadded K) + packed operands, all inside one jit.
# ----------------------------------------------------------------------------
def _im2col_3x3_nhwc(x_nhwc):
    """3x3, stride 1, pad 1.  (N,H,W,C) -> (N*H*W, C*9); column = c*9 + kh*3 + kw."""
    N, H, W, C = x_nhwc.shape
    xp = jnp.pad(x_nhwc, ((0, 0), (1, 1), (1, 1), (0, 0)))
    taps = [xp[:, kh:kh + H, kw:kw + W, :] for kh in range(3) for kw in range(3)]
    patches = jnp.stack(taps, axis=-1)                 # (N, H, W, C, 9)
    return patches.reshape(N * H * W, C * 9)


@functools.partial(
    jax.jit,
    static_argnames=("want_seg", "want_disc", "want_feats", "num_classes", "hidden"))
def _fused_forward(x_nchw, packed, *, want_seg, want_disc, want_feats,
                   num_classes, hidden):
    N, C, H, W = x_nchw.shape
    HW = H * W
    M = N * HW
    K = C * 9
    K_pad = packed["w1"].shape[0]
    assert HW % 8 == 0, "H*W must be a multiple of 8 (sublane tiling)"
    assert K <= K_pad <= LANES

    imgs = _imgs_per_step(N)
    steps = N // imgs

    # Single NCHW -> NHWC transpose at the boundary; channel-last downstream.
    x_nhwc = jnp.transpose(x_nchw, (0, 2, 3, 1))
    patches = _im2col_3x3_nhwc(x_nhwc)                         # (M, C*9) f32
    patches = jnp.pad(patches, ((0, 0), (0, K_pad - K)))       # K -> K_pad only
    patches = patches.astype(jnp.bfloat16)

    kernel = functools.partial(_fused_kernel, want_seg=want_seg,
                               want_disc=want_disc, want_feats=want_feats,
                               imgs=imgs, hw=HW, inv_hw=1.0 / HW)

    row_in_spec = pl.BlockSpec((imgs * HW, K_pad), lambda i: (i, 0))
    row_out_spec = pl.BlockSpec((imgs * HW, LANES), lambda i: (i, 0))
    w1_spec = pl.BlockSpec((K_pad, LANES), lambda i: (0, 0))
    w2_spec = pl.BlockSpec((LANES, LANES), lambda i: (0, 0))
    two_row_spec = pl.BlockSpec((2, LANES), lambda i: (0, 0))

    in_arrays = [patches, packed["w1"], packed["b12"]]
    in_specs = [row_in_spec, w1_spec, two_row_spec]
    if want_seg:
        in_arrays.append(packed["w2"])
        in_specs.append(w2_spec)
    if want_disc:
        in_arrays.append(packed["wd"])
        in_specs.append(two_row_spec)

    out_shapes, out_specs = [], []
    if want_seg:
        out_shapes.append(jax.ShapeDtypeStruct((M, LANES), jnp.bfloat16))
        out_specs.append(row_out_spec)
    if want_disc:
        out_shapes.append(jax.ShapeDtypeStruct((steps, imgs, LANES), jnp.float32))
        out_specs.append(pl.BlockSpec((1, imgs, LANES), lambda i: (i, 0, 0)))
    if want_feats:
        out_shapes.append(jax.ShapeDtypeStruct((M, LANES), jnp.bfloat16))
        out_specs.append(row_out_spec)

    flops = 2 * M * K_pad * LANES + (2 * M * LANES * LANES if want_seg else 0)
    bytes_accessed = sum(a.size * a.dtype.itemsize for a in in_arrays) \
        + sum(math.prod(s.shape) * s.dtype.itemsize for s in out_shapes)

    outs = pl.pallas_call(
        kernel,
        out_shape=tuple(out_shapes),
        grid=(steps,),
        in_specs=in_specs,
        out_specs=tuple(out_specs),
        compiler_params=pltpu.CompilerParams(
            dimension_semantics=("parallel",),
            vmem_limit_bytes=32 * 1024 * 1024),
        cost_estimate=pl.CostEstimate(flops=flops, transcendentals=0,
                                      bytes_accessed=bytes_accessed),
    )(*in_arrays)
    if not isinstance(outs, (tuple, list)):
        outs = (outs,)

    idx = 0
    seg = dom = feats = None
    if want_seg:
        seg_full = outs[idx]; idx += 1
        seg = seg_full[:, :num_classes].astype(jnp.float32)
        seg = seg.reshape(N, H, W, num_classes).transpose(0, 3, 1, 2)   # NCHW out
    if want_disc:
        dom_full = outs[idx]; idx += 1
        dom = dom_full.reshape(N, LANES)[:, :1]                         # (N, 1)
    if want_feats:
        feat_full = outs[idx]; idx += 1
        feats = feat_full[:, :hidden].astype(jnp.float32)
        feats = feats.reshape(N, H, W, hidden).transpose(0, 3, 1, 2)    # NCHW out
    return seg, dom, feats


# ----------------------------------------------------------------------------
# Weight packing: PyTorch-layout weights -> lane-aligned fused operands.
# ----------------------------------------------------------------------------
def _pack_params(in_ch, seg=None, disc=None):
    """Feature-lane layout of the fused conv output:
         [0 : h_seg)              encoder conv channels
         [h_seg : h_seg+h_disc)   discriminator conv channels
         rest                     zero padding
    """
    K = in_ch * 9
    K_pad = min(LANES, max(16, _round_up(K, 16)))
    h_seg = seg.hidden if seg is not None else 0
    h_disc = disc.hidden if disc is not None else 0
    assert K <= LANES and h_seg + h_disc <= LANES

    w1 = jnp.zeros((K_pad, LANES), jnp.float32)
    b12 = jnp.zeros((2, LANES), jnp.float32)     # row0 = conv bias, row1 = seg head bias
    w2 = jnp.zeros((LANES, LANES), jnp.float32)
    wd = jnp.zeros((2, LANES), jnp.float32)      # row0 = disc linear w, row1 = disc bias

    if seg is not None:
        w1 = w1.at[:K, :h_seg].set(seg.w1.reshape(h_seg, K).T)
        b12 = b12.at[0, :h_seg].set(seg.b1)
        w2 = w2.at[:h_seg, :seg.num_classes].set(seg.w2.T)
        b12 = b12.at[1, :seg.num_classes].set(seg.b2)
    if disc is not None:
        w1 = w1.at[:K, h_seg:h_seg + h_disc].set(disc.w1.reshape(h_disc, K).T)
        b12 = b12.at[0, h_seg:h_seg + h_disc].set(disc.b1)
        wd = wd.at[0, h_seg:h_seg + h_disc].set(disc.w2[0, :])
        wd = wd.at[1, :].set(disc.b2[0])

    return dict(w1=w1.astype(jnp.bfloat16), b12=b12,
                w2=w2.astype(jnp.bfloat16), wd=wd)


# ----------------------------------------------------------------------------
# Synthetic sub-models (deterministic init, PyTorch weight layout).
# ----------------------------------------------------------------------------
class TinySegmentationModel:
    """encoder: conv3x3(Cin->hidden)+ReLU; head: conv1x1(hidden->num_classes)."""

    def __init__(self, key, in_ch, hidden, num_classes):
        k1, k2, k3, k4 = jax.random.split(key, 4)
        self.in_ch = in_ch
        self.hidden = hidden
        self.num_classes = num_classes
        self.w1 = 0.1 * jax.random.normal(k1, (hidden, in_ch, 3, 3), jnp.float32)
        self.b1 = 0.01 * jax.random.normal(k2, (hidden,), jnp.float32)
        self.w2 = 0.1 * jax.random.normal(k3, (num_classes, hidden), jnp.float32)
        self.b2 = 0.01 * jax.random.normal(k4, (num_classes,), jnp.float32)
        self._packed = _pack_params(in_ch, seg=self)

    def encoder(self, x):
        _, _, feats = _fused_forward(x, self._packed, want_seg=False,
                                     want_disc=False, want_feats=True,
                                     num_classes=self.num_classes,
                                     hidden=self.hidden)
        return feats

    def __call__(self, x):
        seg, _, _ = _fused_forward(x, self._packed, want_seg=True,
                                   want_disc=False, want_feats=False,
                                   num_classes=self.num_classes,
                                   hidden=self.hidden)
        return seg

    def parameters(self):
        return [self.w1, self.b1, self.w2, self.b2]

    def train(self, mode=True):
        return self

    def eval(self):
        return self


class TinyDiscriminator:
    """conv3x3(Cin->hidden)+ReLU -> global avg pool -> linear(hidden->1)."""

    def __init__(self, key, in_ch, hidden):
        k1, k2, k3, k4 = jax.random.split(key, 4)
        self.in_ch = in_ch
        self.hidden = hidden
        self.w1 = 0.1 * jax.random.normal(k1, (hidden, in_ch, 3, 3), jnp.float32)
        self.b1 = 0.01 * jax.random.normal(k2, (hidden,), jnp.float32)
        self.w2 = 0.1 * jax.random.normal(k3, (1, hidden), jnp.float32)
        self.b2 = 0.01 * jax.random.normal(k4, (1,), jnp.float32)
        self._packed = _pack_params(in_ch, disc=self)

    def __call__(self, x):
        _, dom, _ = _fused_forward(x, self._packed, want_seg=False,
                                   want_disc=True, want_feats=False,
                                   num_classes=1, hidden=self.hidden)
        return dom

    def parameters(self):
        return [self.w1, self.b1, self.w2, self.b2]

    def train(self, mode=True):
        return self

    def eval(self):
        return self


# ----------------------------------------------------------------------------
# DomainAdaptationModel wrapper (mirrors the PyTorch module's forward).
# ----------------------------------------------------------------------------
class DomainAdaptationModel:
    """Wrapper for segmentation model with domain adaptation support.

    domain_adaptation=True shares a single im2col and ONE fused pallas_call
    between the segmentation model and the discriminator; the discriminator
    head is a pure VPU epilogue (no extra matmul / HBM round trip).
    """

    def __init__(self, segmentation_model, discriminator=None):
        self.segmentation_model = segmentation_model
        self.discriminator = discriminator
        if discriminator is not None:
            assert discriminator.in_ch == segmentation_model.in_ch
        self._packed = _pack_params(segmentation_model.in_ch,
                                    seg=segmentation_model,
                                    disc=discriminator)

    def __call__(self, x, domain_adaptation=False):
        want_disc = bool(domain_adaptation and self.discriminator is not None)
        seg, dom, _ = _fused_forward(
            x, self._packed, want_seg=True, want_disc=want_disc,
            want_feats=False,
            num_classes=self.segmentation_model.num_classes,
            hidden=self.segmentation_model.hidden)
        if want_disc:
            return seg, dom
        return seg

    forward = __call__

    def get_features(self, x):
        if hasattr(self.segmentation_model, "encoder"):
            return self.segmentation_model.encoder(x)
        return None

    def train(self, mode=True):
        self.segmentation_model.train(mode)
        if self.discriminator is not None:
            self.discriminator.train(mode)
        return self

    def eval(self):
        self.segmentation_model.eval()
        if self.discriminator is not None:
            self.discriminator.eval()
        return self

    def to(self, device):
        return self

    def parameters(self):
        params = list(self.segmentation_model.parameters())
        if self.discriminator is not None:
            params.extend(list(self.discriminator.parameters()))
        return params


# ----------------------------------------------------------------------------
# Plain-JAX f32 reference (loose sanity check of the fused kernel).
# ----------------------------------------------------------------------------
def _reference(x, seg_model, disc):
    N, C, H, W = x.shape
    patches = _im2col_3x3_nhwc(jnp.transpose(x, (0, 2, 3, 1)))   # (M, C*9)
    f_enc = jnp.maximum(
        patches @ seg_model.w1.reshape(seg_model.hidden, -1).T + seg_model.b1, 0.0)
    seg = f_enc @ seg_model.w2.T + seg_model.b2
    seg = seg.reshape(N, H, W, -1).transpose(0, 3, 1, 2)
    f_disc = jnp.maximum(
        patches @ disc.w1.reshape(disc.hidden, -1).T + disc.b1, 0.0)
    pooled = f_disc.reshape(N, H * W, -1).mean(axis=1)
    dom = pooled @ disc.w2.T + disc.b2
    return seg, dom


# ----------------------------------------------------------------------------
if __name__ == "__main__":
    batch, in_ch, spatial = 2, 4, 16
    hidden, num_classes = 32, 3

    key = jax.random.PRNGKey(0)
    k_in, k_seg, k_disc, k_in2 = jax.random.split(key, 4)

    x = jax.random.normal(k_in, (batch, in_ch, spatial, spatial), jnp.float32)

    seg_model = TinySegmentationModel(k_seg, in_ch, hidden, num_classes)
    discriminator = TinyDiscriminator(k_disc, in_ch, hidden)
    model = DomainAdaptationModel(seg_model, discriminator)

    # Plain segmentation forward.
    seg_only = model(x, domain_adaptation=False)
    # Domain-adaptation forward (single fused kernel for seg + discriminator).
    seg_pred, domain_pred = model(x, domain_adaptation=True)
    # Encoder features.
    feats = model.get_features(x)

    jax.block_until_ready((seg_only, seg_pred, domain_pred, feats))

    assert seg_only.shape == (batch, num_classes, spatial, spatial)
    assert seg_pred.shape == (batch, num_classes, spatial, spatial)
    assert domain_pred.shape == (batch, 1)
    assert feats.shape == (batch, hidden, spatial, spatial)

    # Loose numeric sanity check vs an f32 reference (kernel uses bf16 MXU
    # inputs and bf16 seg output).
    seg_ref, dom_ref = _reference(x, seg_model, discriminator)
    assert bool(jnp.allclose(seg_pred, seg_ref, atol=5e-2, rtol=5e-2))
    assert bool(jnp.allclose(domain_pred, dom_ref, atol=5e-2, rtol=5e-2))
    assert bool(jnp.allclose(seg_only, seg_ref, atol=5e-2, rtol=5e-2))

    # Exercise the multi-image-per-step path (batch 4 -> 2 images/step, grid=2).
    x4 = jax.random.normal(k_in2, (4, in_ch, spatial, spatial), jnp.float32)
    seg4, dom4 = model(x4, domain_adaptation=True)
    jax.block_until_ready((seg4, dom4))
    seg4_ref, dom4_ref = _reference(x4, seg_model, discriminator)
    assert seg4.shape == (4, num_classes, spatial, spatial)
    assert dom4.shape == (4, 1)
    assert bool(jnp.allclose(seg4, seg4_ref, atol=5e-2, rtol=5e-2))
    assert bool(jnp.allclose(dom4, dom4_ref, atol=5e-2, rtol=5e-2))

    print("KERNEL_OK")
</pallas_src>

<mosaic_0001>
module attributes {stable_mosaic.version = 11 : i64} {
  func.func @_fused_kernel(%arg0: i32, %arg1: memref<256x48xbf16, #tpu.memory_space<vmem>>, %arg2: memref<48x128xbf16, #tpu.memory_space<vmem>>, %arg3: memref<2x128xf32, #tpu.memory_space<vmem>>, %arg4: memref<128x128xbf16, #tpu.memory_space<vmem>>, %arg5: memref<256x128xbf16, #tpu.memory_space<vmem>>) attributes {dimension_semantics = [#tpu.dimension_semantics<parallel>], iteration_bounds = array<i64: 2>, scalar_prefetch = 0 : i64, scratch_operands = 0 : i64, tpu.core_type = #tpu.core_type<tc>, window_params = [{transform_indices = @transform_0, window_bounds = array<i64: 256, 48>}, {pipeline_mode = #tpu.pipeline_mode<synchronous>, transform_indices = @transform_1, window_bounds = array<i64: 48, 128>}, {pipeline_mode = #tpu.pipeline_mode<synchronous>, transform_indices = @transform_2, window_bounds = array<i64: 2, 128>}, {pipeline_mode = #tpu.pipeline_mode<synchronous>, transform_indices = @transform_3, window_bounds = array<i64: 128, 128>}, {transform_indices = @transform_4, window_bounds = array<i64: 256, 128>}]} {
    %c0 = arith.constant 0 : index
    %c0_0 = arith.constant 0 : index
    %0 = vector.load %arg1[%c0, %c0_0] : memref<256x48xbf16, #tpu.memory_space<vmem>>, vector<256x48xbf16>
    %c0_1 = arith.constant 0 : index
    %c0_2 = arith.constant 0 : index
    %1 = vector.load %arg2[%c0_1, %c0_2] : memref<48x128xbf16, #tpu.memory_space<vmem>>, vector<48x128xbf16>
    %cst = arith.constant dense<0.000000e+00> : vector<256x128xf32>
    %2 = tpu.matmul %0, %1, %cst {dimension_numbers = #tpu.dot_dimension_numbers<[1], [0], [0], [1], [0, 0, 1, 1], [], []>} : vector<256x48xbf16>, vector<48x128xbf16>, vector<256x128xf32> -> vector<256x128xf32>
    %c0_3 = arith.constant 0 : index
    %c0_4 = arith.constant 0 : index
    %3 = vector.load %arg3[%c0_3, %c0_4] : memref<2x128xf32, #tpu.memory_space<vmem>>, vector<1x128xf32>
    %4 = vector.broadcast %3 : vector<1x128xf32> to vector<256x128xf32>
    %5 = arith.addf %2, %4 : vector<256x128xf32>
    %cst_5 = arith.constant 0.000000e+00 : f32
    %6 = vector.broadcast %cst_5 : f32 to vector<256x128xf32>
    %7 = arith.maximumf %5, %6 : vector<256x128xf32>
    %8 = arith.truncf %7 : vector<256x128xf32> to vector<256x128xbf16>
    %c0_6 = arith.constant 0 : index
    %c0_7 = arith.constant 0 : index
    %9 = vector.load %arg4[%c0_6, %c0_7] : memref<128x128xbf16, #tpu.memory_space<vmem>>, vector<128x128xbf16>
    %cst_8 = arith.constant dense<0.000000e+00> : vector<256x128xf32>
    %10 = tpu.matmul %8, %9, %cst_8 {dimension_numbers = #tpu.dot_dimension_numbers<[1], [0], [0], [1], [0, 0, 1, 1], [], []>} : vector<256x128xbf16>, vector<128x128xbf16>, vector<256x128xf32> -> vector<256x128xf32>
    %c1 = arith.constant 1 : index
    %c0_9 = arith.constant 0 : index
    %11 = vector.load %arg3[%c1, %c0_9] : memref<2x128xf32, #tpu.memory_space<vmem>>, vector<1x128xf32>
    %12 = vector.broadcast %11 : vector<1x128xf32> to vector<256x128xf32>
    %13 = arith.addf %10, %12 : vector<256x128xf32>
    %14 = arith.truncf %13 : vector<256x128xf32> to vector<256x128xbf16>
    %c0_10 = arith.constant 0 : index
    %c0_11 = arith.constant 0 : index
    %15 = vector.load %arg5[%c0_10, %c0_11] : memref<256x128xbf16, #tpu.memory_space<vmem>>, vector<256x128xbf16>
    tpu.vector_store %arg5[%c0_10, %c0_11], %14 {strides = array<i32>} : memref<256x128xbf16, #tpu.memory_space<vmem>>, vector<256x128xbf16>,
    return
  }
  func.func @transform_0(%arg0: i32) -> (i32, i32) {
    %c0_i32 = arith.constant 0 : i32
    %c0_i32_0 = arith.constant 0 : i32
    return %arg0, %c0_i32 : i32, i32
  }
  func.func @transform_1(%arg0: i32) -> (i32, i32) {
    %c0_i32 = arith.constant 0 : i32
    %c0_i32_0 = arith.constant 0 : i32
    %c0_i32_1 = arith.constant 0 : i32
    return %c0_i32, %c0_i32_0 : i32, i32
  }
  func.func @transform_2(%arg0: i32) -> (i32, i32) {
    %c0_i32 = arith.constant 0 : i32
    %c0_i32_0 = arith.constant 0 : i32
    %c0_i32_1 = arith.constant 0 : i32
    return %c0_i32, %c0_i32_0 : i32, i32
  }
  func.func @transform_3(%arg0: i32) -> (i32, i32) {
    %c0_i32 = arith.constant 0 : i32
    %c0_i32_0 = arith.constant 0 : i32
    %c0_i32_1 = arith.constant 0 : i32
    return %c0_i32, %c0_i32_0 : i32, i32
  }
  func.func @transform_4(%arg0: i32) -> (i32, i32) {
    %c0_i32 = arith.constant 0 : i32
    %c0_i32_0 = arith.constant 0 : i32
    return %arg0, %c0_i32 : i32, i32
  }
}

</mosaic_0001>

<bundles_post_ra>
// kernel: _fused_forward.1
= control target key start
LH: loop header
LB: loop body
LE: loop exit
PB: predicated region body
PF: predicated region fallthrough
CT: control target
= control target key end

     0   :  { %s1475_s15 = smov 0   ;;  %s1658_s0 = inlined_call_operand.vmem [shape: bf16[512,48], index: 0, kind: input, shape index: {}]   ;;  %s1659_s1 = inlined_call_operand.vmem [shape: bf16[48,128], index: 1, kind: input, shape index: {}]   ;;  %s1660_s2 = inlined_call_operand.vmem [shape: f32[2,128], index: 2, kind: input, shape index: {}]   ;;  %s1661_s3 = inlined_call_operand.vmem [shape: bf16[128,128], index: 3, kind: input, shape index: {}]   ;;  %s1662_s4 = inlined_call_operand.vmem [shape: bf16[512,128], index: 4, kind: output, shape index: {}]  }
   0x1 LB: > { %s1047_s16 = sadd.s32 4294967295, %s1448_s15   ;;  %p1051_p0 = scmp.ge.s32.totalorder %s1448_s15, 1  ;;  %s1448_s15 = sphi %s1475_s15, %s14_s15  }
   0x2   : > { %p163_p1 = scmp.lt.s32.totalorder %s1448_s15, 3 }
   0x4   : > { %p164_p2 = pnand %p1051_p0, %p163_p1 }
   0x5   : > { %v1415_v0 = vld [vmem:[%s1659_s1] sm:$0xff] (!%p164_p2)   ;;  %s1052_s19 = sshll.u32 (!%p164_p2), %s1047_s16, 5  ;;  %v1416_v1 = vld [vmem:[%s1659_s1 + $0x8] sm:$0xff] (!%p164_p2)   ;;  %v1417_v3 = vld [vmem:[%s1659_s1 + $0x10] sm:$0xff] (!%p164_p2)   ;;  %vm343_vm0 = vcmask (!%p164_p2), 392192  }
   0x6   : > { %167 = sbr.rel (%p164_p2) target bundleno = 516 (0x204), region = 36  ;;  %p190_p3 = scmp.lt.s32.totalorder (!%p164_p2), %s1052_s19, 63  ;;  %1305 = vmatprep.subr.bf16.mxu0 (!%p164_p2), %v1415_v0  ;;  %v1434_v2 = vld [vmem:[%s1661_s3] sm:$0xff] (!%p164_p2)   ;;  %v1435_v4 = vld [vmem:[%s1661_s3 + $0x8] sm:$0xff] (!%p164_p2)   ;;  %v1436_v6 = vld [vmem:[%s1661_s3 + $0x10] sm:$0xff] (!%p164_p2)  }
   0x7   : > { %1306 = vmatpush3.bf16.msra.mxu0 (!%p164_p2), %v1415_v0  ;;  %1391 = vmatprep.subr.bf16.mxu1 (!%p164_p2), %v1434_v2  ;;  %v1437_v9 = vld [vmem:[%s1661_s3 + $0x18] sm:$0xff] (!%p164_p2)   ;;  %v1438_v12 = vld [vmem:[%s1661_s3 + $0x20] sm:$0xff] (!%p164_p2)   ;;  %v1439_v13 = vld [vmem:[%s1661_s3 + $0x28] sm:$0xff] (!%p164_p2)  }
   0x8   : > { %1307 = vmatprep.subr.bf16.mxu0 (!%p164_p2), %v1416_v1  ;;  %1399 = vmatpush3.bf16.msra.mxu1 (!%p164_p2), %v1434_v2  ;;  %v1440_v25 = vld [vmem:[%s1661_s3 + $0x30] sm:$0xff] (!%p164_p2)   ;;  %v1441_v26 = vld [vmem:[%s1661_s3 + $0x38] sm:$0xff] (!%p164_p2)   ;;  %v1561_v27 = vld [vmem:[%s1660_s2] ss:$0 sm:$0xff] (!%p164_p2) }
   0x9   : > { %1392 = vmatprep.subr.bf16.mxu1 (!%p164_p2), %v1435_v4 }
   0xb   : > { %1308 = vmatpush3.bf16.msra.mxu0 (!%p164_p2), %v1416_v1 }
   0xc   : > { %1309 = vmatprep.subr.bf16.mxu0 (!%p164_p2), %v1417_v3  ;;  %1400 = vmatpush3.bf16.msra.mxu1 (!%p164_p2), %v1435_v4 }
   0xd   : > { %s1664_s19 = smov (!%p190_p3, %s1052_s19), 63  ;;  %1393 = vmatprep.subr.bf16.mxu1 %v1436_v6 }
   0xe   : > { %s1053_s26 = sshll.u32 %s1664_s19, 2 }
   0xf   : > { %s1506_s5 = scalar_lea.vmem %s1658_s0, %s1053_s26  ;;  %1310 = vmatpush3.bf16.msra.mxu0 %v1417_v3  ;;  %s1608_s27 = scalar_lea.vmem %s1662_s4, %s1053_s26 }
  0x10   : > { %v1418_v5 = vld [vmem:[%s1506_s5] sm:$0xff]   ;;  %v1419_v7 = vld [vmem:[%s1506_s5 + $0x8] sm:$0xff]   ;;  %v1420_v8 = vld [vmem:[%s1506_s5 + $0x10] sm:$0xff]   ;;  %1343 = vmatprep.subr.bf16.mxu0 %v1434_v2  ;;  %1401 = vmatpush3.bf16.msra.mxu1 %v1436_v6 }
  0x11   : > { %1311 = vmatprep.mubr.msk.bf16.mxu0 %vm343_vm0, %v1418_v5  ;;  %1394 = vmatprep.subr.bf16.mxu1 %v1437_v9  ;;  %v1421_v10 = vld [vmem:[%s1506_s5 + $0x18] sm:$0xff]   ;;  %v1422_v11 = vld [vmem:[%s1506_s5 + $0x20] sm:$0xff]   ;;  %v1423_v14 = vld [vmem:[%s1506_s5 + $0x28] sm:$0xff]  }
  0x12   : > { %1312 = vmatmul.mubr.msk.bf16.vlgmr.msra.gmra.mrb[0].mxu0 %vm343_vm0, %v1419_v7  ;;  %v1424_v15 = vld [vmem:[%s1506_s5 + $0x30] sm:$0xff]   ;;  %v1425_v16 = vld [vmem:[%s1506_s5 + $0x38] sm:$0xff]   ;;  %v1426_v17 = vld [vmem:[%s1506_s5 + $0x40] sm:$0xff]  }
  0x13   : > { %1315 = vmatprep.mubr.msk.bf16.mxu0 %vm343_vm0, %v1420_v8  ;;  %1344 = vmatpush3.bf16.msra.mxu0 %v1434_v2  ;;  %v1427_v18 = vld [vmem:[%s1506_s5 + $0x48] sm:$0xff]   ;;  %v1428_v19 = vld [vmem:[%s1506_s5 + $0x50] sm:$0xff]   ;;  %v1429_v20 = vld [vmem:[%s1506_s5 + $0x58] sm:$0xff]  }
  0x14   : > { %1345 = vmatprep.subr.bf16.mxu0 %v1435_v4  ;;  %1402 = vmatpush3.bf16.msra.mxu1 %v1437_v9  ;;  %v1430_v21 = vld [vmem:[%s1506_s5 + $0x60] sm:$0xff]   ;;  %v1431_v22 = vld [vmem:[%s1506_s5 + $0x68] sm:$0xff]   ;;  %v1432_v23 = vld [vmem:[%s1506_s5 + $0x70] sm:$0xff]  }
  0x15   : > { %1395 = vmatprep.subr.bf16.mxu1 %v1438_v12  ;;  %v1433_v24 = vld [vmem:[%s1506_s5 + $0x78] sm:$0xff]  }
  0x17   : > { %1346 = vmatpush3.bf16.msra.mxu0 %v1435_v4 }
  0x18   : > { %1347 = vmatprep.subr.bf16.mxu0 %v1436_v6  ;;  %1403 = vmatpush3.bf16.msra.mxu1 %v1438_v12 }
  0x19   : > { %1396 = vmatprep.subr.bf16.mxu1 %v1439_v13 }
  0x1a   : > { %1316 = vmatmul.mubr.msk.bf16.gmra.mrb[4].mxu0 %vm343_vm0, %v1421_v10 }
  0x1b   : > { %1319 = vmatprep.mubr.msk.bf16.mxu0 %vm343_vm0, %v1422_v11  ;;  %1348 = vmatpush3.bf16.msra.mxu0 %v1436_v6 }
  0x1c   : > { %1349 = vmatprep.subr.bf16.mxu0 %v1437_v9  ;;  %1404 = vmatpush3.bf16.msra.mxu1 %v1439_v13 }
  0x1d   : > { %1397 = vmatprep.subr.bf16.mxu1 %v1440_v25 }
  0x1f   : > { %1350 = vmatpush3.bf16.msra.mxu0 %v1437_v9 }
  0x20   : > { %1351 = vmatprep.subr.bf16.mxu0 %v1438_v12  ;;  %1405 = vmatpush3.bf16.msra.mxu1 %v1440_v25 }
  0x21   : > { %1398 = vmatprep.subr.bf16.mxu1 %v1441_v26 }
  0x22   : > { %1320 = vmatmul.mubr.msk.bf16.gmra.mrb[8].mxu0 %vm343_vm0, %v1423_v14 }
  0x23   : > { %1323 = vmatprep.mubr.msk.bf16.mxu0 %vm343_vm0, %v1424_v15  ;;  %1352 = vmatpush3.bf16.msra.mxu0 %v1438_v12 }
  0x24   : > { %1353 = vmatprep.subr.bf16.mxu0 %v1439_v13  ;;  %1406 = vmatpush3.bf16.msra.mxu1 %v1441_v26 }
  0x27   : > { %1354 = vmatpush3.bf16.msra.mxu0 %v1439_v13 }
  0x28   : > { %1355 = vmatprep.subr.bf16.mxu0 %v1440_v25 }
  0x2a   : > { %1324 = vmatmul.mubr.msk.bf16.gmra.mrb[12].mxu0 %vm343_vm0, %v1425_v16 }
  0x2b   : > { %1327 = vmatprep.mubr.msk.bf16.mxu0 %vm343_vm0, %v1426_v17  ;;  %1356 = vmatpush3.bf16.msra.mxu0 %v1440_v25 }
  0x2c   : > { %1357 = vmatprep.subr.bf16.mxu0 %v1441_v26 }
  0x2f   : > { %1358 = vmatpush3.bf16.msra.mxu0 %v1441_v26 }
  0x32   : > { %1328 = vmatmul.mubr.msk.bf16.gmra.mrb[16].mxu0 %vm343_vm0, %v1427_v18 }
  0x33   : > { %1331 = vmatprep.mubr.msk.bf16.mxu0 %vm343_vm0, %v1428_v19 }
  0x3a   : > { %1332 = vmatmul.mubr.msk.bf16.gmra.mrb[20].mxu0 %vm343_vm0, %v1429_v20 }
  0x3b   : > { %1335 = vmatprep.mubr.msk.bf16.mxu0 %vm343_vm0, %v1430_v21 }
  0x42   : > { %1336 = vmatmul.mubr.msk.bf16.gmra.mrb[24].mxu0 %vm343_vm0, %v1431_v22 }
  0x43   : > { %1339 = vmatprep.mubr.msk.bf16.mxu0 %vm343_vm0, %v1432_v23 }
  0x4a   : > { %1340 = vmatmul.mubr.msk.bf16.gmra.mrb[28].mxu0 %vm343_vm0, %v1433_v24 }
  0xe5   : > { %v1313_v28 = vpop.f32.mrb[0].mxu0 }
  0xe6   : > { %v435_v29 = vadd.f32 %v1313_v28, %v1561_v27  ;;  %v426_v30 = vpop.f32.mrb[1].mxu0 }
  0xe7   : > { %v427_v31 = vadd.f32 %v1561_v27, %v426_v30  ;;  %v1314_v32 = vpop.f32.mrb[2].mxu0 }
  0xe8   : > { %v438_v33 = vadd.f32 %v1314_v32, %v1561_v27  ;;  %v429_v34 = vpop.f32.mrb[3].mxu0  ;;  %v555_v36 = vmax.f32 %v435_v29, 0.0 }
  0xe9   : > { %v430_v35 = vadd.f32 %v1561_v27, %v429_v34  ;;  %v553_v38 = vmax.f32 %v427_v31, 0.0 }
  0xea   : > { %v556_v37 = vmax.f32 %v438_v33, 0.0 }
  0xeb   : > { %v554_v39 = vmax.f32 %v430_v35, 0.0 }
  0xec   : > { %v586_v40 = vpack.c.bf16 %v556_v37, %v555_v36 }
  0xed   : > { %v585_v41 = vpack.c.bf16 %v554_v39, %v553_v38  ;;  %v1317_v42 = vpop.f32.mrb[4].mxu0 }
  0xee   : > { %v451_v43 = vadd.f32 %v1317_v42, %v1561_v27  ;;  %v442_v44 = vpop.f32.mrb[5].mxu0 }
  0xef   : > { %v443_v45 = vadd.f32 %v1561_v27, %v442_v44  ;;  %v1318_v46 = vpop.f32.mrb[6].mxu0  ;;  %1359 = vmatprep.mubr.bf16.mxu0 %v585_v41 }
  0xf0   : > { %v454_v47 = vadd.f32 %v1318_v46, %v1561_v27  ;;  %v445_v48 = vpop.f32.mrb[7].mxu0  ;;  %1360 = vmatmul.mubr.bf16.vlgmr.msra.gmra.mrb[32].mxu0 %v586_v40  ;;  %v559_v50 = vmax.f32 %v451_v43, 0.0 }
  0xf1   : > { %v446_v49 = vadd.f32 %v1561_v27, %v445_v48  ;;  %v557_v52 = vmax.f32 %v443_v45, 0.0 }
  0xf2   : > { %v560_v51 = vmax.f32 %v454_v47, 0.0 }
  0xf3   : > { %v558_v53 = vmax.f32 %v446_v49, 0.0 }
  0xf4   : > { %v588_v54 = vpack.c.bf16 %v560_v51, %v559_v50 }
  0xf5   : > { %v1321_v55 = vpop.f32.mrb[8].mxu0  ;;  %v587_v56 = vpack.c.bf16 %v558_v53, %v557_v52 }
  0xf6   : > { %v467_v57 = vadd.f32 %v1321_v55, %v1561_v27  ;;  %v458_v58 = vpop.f32.mrb[9].mxu0 }
  0xf7   : > { %v459_v59 = vadd.f32 %v1561_v27, %v458_v58  ;;  %v1322_v60 = vpop.f32.mrb[10].mxu0  ;;  %1363 = vmatprep.mubr.bf16.mxu1 %v587_v56 }
  0xf8   : > { %v470_v61 = vadd.f32 %v1322_v60, %v1561_v27  ;;  %v461_v62 = vpop.f32.mrb[11].mxu0  ;;  %1364 = vmatmul.mubr.bf16.vlgmr.msra.gmra.mrb[0].mxu1 %v588_v54  ;;  %v563_v0 = vmax.f32 %v467_v57, 0.0 }
  0xf9   : > { %v462_v63 = vadd.f32 %v1561_v27, %v461_v62  ;;  %v561_v2 = vmax.f32 %v459_v59, 0.0 }
  0xfa   : > { %v564_v1 = vmax.f32 %v470_v61, 0.0 }
  0xfb   : > { %v562_v3 = vmax.f32 %v462_v63, 0.0 }
  0xfc   : > { %v590_v4 = vpack.c.bf16 %v564_v1, %v563_v0 }
  0xfd   : > { %v589_v5 = vpack.c.bf16 %v562_v3, %v561_v2  ;;  %v1325_v6 = vpop.f32.mrb[12].mxu0 }
  0xfe   : > { %v483_v7 = vadd.f32 %v1325_v6, %v1561_v27  ;;  %v474_v8 = vpop.f32.mrb[13].mxu0 }
  0xff   : > { %v475_v9 = vadd.f32 %v1561_v27, %v474_v8  ;;  %v1326_v10 = vpop.f32.mrb[14].mxu0  ;;  %1367 = vmatprep.mubr.bf16.mxu1 %v589_v5 }
 0x100   : > { %v486_v11 = vadd.f32 %v1326_v10, %v1561_v27  ;;  %v477_v12 = vpop.f32.mrb[15].mxu0  ;;  %1368 = vmatmul.mubr.bf16.gmra.mrb[4].mxu1 %v590_v4  ;;  %v567_v14 = vmax.f32 %v483_v7, 0.0 }
 0x101   : > { %v478_v13 = vadd.f32 %v1561_v27, %v477_v12  ;;  %v565_v16 = vmax.f32 %v475_v9, 0.0 }
 0x102   : > { %v568_v15 = vmax.f32 %v486_v11, 0.0 }
 0x103   : > { %v566_v17 = vmax.f32 %v478_v13, 0.0 }
 0x104   : > { %v592_v18 = vpack.c.bf16 %v568_v15, %v567_v14  ;;  %v1598_v14 = vld [vmem:[%s1660_s2 + $0x1] ss:$0 sm:$0xff] }
 0x105   : > { %v591_v19 = vpack.c.bf16 %v566_v17, %v565_v16  ;;  %v1329_v20 = vpop.f32.mrb[16].mxu0 }
 0x106   : > { %v499_v21 = vadd.f32 %v1329_v20, %v1561_v27  ;;  %v490_v22 = vpop.f32.mrb[17].mxu0 }
 0x107   : > { %v491_v23 = vadd.f32 %v1561_v27, %v490_v22  ;;  %v1330_v24 = vpop.f32.mrb[18].mxu0  ;;  %1371 = vmatprep.mubr.bf16.mxu1 %v591_v19 }
 0x108   : > { %v502_v25 = vadd.f32 %v1330_v24, %v1561_v27  ;;  %v493_v26 = vpop.f32.mrb[19].mxu0  ;;  %1372 = vmatmul.mubr.bf16.gmra.mrb[8].mxu1 %v592_v18  ;;  %v571_v29 = vmax.f32 %v499_v21, 0.0 }
 0x109   : > { %v494_v28 = vadd.f32 %v1561_v27, %v493_v26  ;;  %v569_v31 = vmax.f32 %v491_v23, 0.0 }
 0x10a   : > { %v572_v30 = vmax.f32 %v502_v25, 0.0 }
 0x10b   : > { %v570_v32 = vmax.f32 %v494_v28, 0.0 }
 0x10c   : > { %v594_v33 = vpack.c.bf16 %v572_v30, %v571_v29 }
 0x10d   : > { %v593_v34 = vpack.c.bf16 %v570_v32, %v569_v31  ;;  %v1333_v35 = vpop.f32.mrb[20].mxu0 }
 0x10e   : > { %v515_v36 = vadd.f32 %v1333_v35, %v1561_v27  ;;  %v506_v37 = vpop.f32.mrb[21].mxu0 }
 0x10f   : > { %v507_v38 = vadd.f32 %v1561_v27, %v506_v37  ;;  %v1334_v39 = vpop.f32.mrb[22].mxu0  ;;  %1375 = vmatprep.mubr.bf16.mxu1 %v593_v34 }
 0x110   : > { %v518_v40 = vadd.f32 %v1334_v39, %v1561_v27  ;;  %v509_v41 = vpop.f32.mrb[23].mxu0  ;;  %1376 = vmatmul.mubr.bf16.gmra.mrb[12].mxu1 %v594_v33  ;;  %v575_v43 = vmax.f32 %v515_v36, 0.0 }
 0x111   : > { %v510_v42 = vadd.f32 %v1561_v27, %v509_v41  ;;  %v573_v45 = vmax.f32 %v507_v38, 0.0 }
 0x112   : > { %v576_v44 = vmax.f32 %v518_v40, 0.0 }
 0x113   : > { %v574_v46 = vmax.f32 %v510_v42, 0.0 }
 0x114   : > { %v596_v47 = vpack.c.bf16 %v576_v44, %v575_v43 }
 0x115   : > { %v595_v48 = vpack.c.bf16 %v574_v46, %v573_v45  ;;  %v1337_v49 = vpop.f32.mrb[24].mxu0 }
 0x116   : > { %v531_v50 = vadd.f32 %v1337_v49, %v1561_v27  ;;  %v522_v51 = vpop.f32.mrb[25].mxu0 }
 0x117   : > { %v523_v52 = vadd.f32 %v1561_v27, %v522_v51  ;;  %v1338_v53 = vpop.f32.mrb[26].mxu0  ;;  %1379 = vmatprep.mubr.bf16.mxu1 %v595_v48 }
 0x118   : > { %v534_v54 = vadd.f32 %v1338_v53, %v1561_v27  ;;  %v525_v55 = vpop.f32.mrb[27].mxu0  ;;  %1380 = vmatmul.mubr.bf16.gmra.mrb[16].mxu1 %v596_v47  ;;  %v579_v57 = vmax.f32 %v531_v50, 0.0 }
 0x119   : > { %v526_v56 = vadd.f32 %v1561_v27, %v525_v55  ;;  %v577_v59 = vmax.f32 %v523_v52, 0.0 }
 0x11a   : > { %v580_v58 = vmax.f32 %v534_v54, 0.0 }
 0x11b   : > { %v578_v60 = vmax.f32 %v526_v56, 0.0 }
 0x11c   : > { %v598_v61 = vpack.c.bf16 %v580_v58, %v579_v57 }
 0x11d   : > { %v597_v62 = vpack.c.bf16 %v578_v60, %v577_v59  ;;  %v1341_v63 = vpop.f32.mrb[28].mxu0 }
 0x11e   : > { %v547_v0 = vadd.f32 %v1341_v63, %v1561_v27  ;;  %v538_v1 = vpop.f32.mrb[29].mxu0 }
 0x11f   : > { %v539_v2 = vadd.f32 %v1561_v27, %v538_v1  ;;  %v1342_v3 = vpop.f32.mrb[30].mxu0  ;;  %1383 = vmatprep.mubr.bf16.mxu1 %v597_v62 }
 0x120   : > { %v550_v4 = vadd.f32 %v1342_v3, %v1561_v27  ;;  %v541_v5 = vpop.f32.mrb[31].mxu0  ;;  %1384 = vmatmul.mubr.bf16.gmra.mrb[20].mxu1 %v598_v61  ;;  %v583_v7 = vmax.f32 %v547_v0, 0.0 }
 0x121   : > { %v542_v6 = vadd.f32 %v1561_v27, %v541_v5  ;;  %v581_v9 = vmax.f32 %v539_v2, 0.0 }
 0x122   : > { %v584_v8 = vmax.f32 %v550_v4, 0.0 }
 0x123   : > { %v582_v10 = vmax.f32 %v542_v6, 0.0 }
 0x124   : > { %v600_v11 = vpack.c.bf16 %v584_v8, %v583_v7 }
 0x125   : > { %v599_v12 = vpack.c.bf16 %v582_v10, %v581_v9 }
 0x127   : > { %1387 = vmatprep.mubr.bf16.mxu1 %v599_v12 }
 0x128   : > { %1388 = vmatmul.mubr.bf16.gmra.mrb[24].mxu1 %v600_v11 }
 0x1c3   : > { %v1361_v13 = vpop.f32.mrb[32].mxu0 }
 0x1c4   : > { %v704_v15 = vpop.f32.mrb[33].mxu0  ;;  %v713_v17 = vadd.f32 %v1361_v13, %v1598_v14 }
 0x1c5   : > { %v1362_v16 = vpop.f32.mrb[34].mxu0  ;;  %v705_v19 = vadd.f32 %v1598_v14, %v704_v15 }
 0x1c6   : > { %v716_v27 = vadd.f32 %v1362_v16, %v1598_v14  ;;  %v707_v18 = vpop.f32.mrb[35].mxu0 }
 0x1c7   : > { %v708_v20 = vadd.f32 %v1598_v14, %v707_v18 }
 0x1c8   : > { %v1175_v21 = vpack.c.bf16 %v716_v27, %v713_v17 }
 0x1c9   : > { %v1170_v22 = vpack.c.bf16 %v708_v20, %v705_v19 }
 0x1ca   : > { %1247 = vst [vmem:[%s1608_s27 + $0x8] sm:$0xff] %v1175_v21  }
 0x1cb   : > { %1171 = vst [vmem:[%s1608_s27] sm:$0xff] %v1170_v22   ;;  %v1365_v23 = vpop.f32.mrb[0].mxu1 }
 0x1cc   : > { %v720_v24 = vpop.f32.mrb[1].mxu1  ;;  %v729_v26 = vadd.f32 %v1365_v23, %v1598_v14 }
 0x1cd   : > { %v1366_v25 = vpop.f32.mrb[2].mxu1  ;;  %v721_v30 = vadd.f32 %v1598_v14, %v720_v24 }
 0x1ce   : > { %v732_v28 = vadd.f32 %v1366_v25, %v1598_v14  ;;  %v723_v29 = vpop.f32.mrb[3].mxu1 }
 0x1cf   : > { %v724_v31 = vadd.f32 %v1598_v14, %v723_v29 }
 0x1d0   : > { %v1185_v32 = vpack.c.bf16 %v732_v28, %v729_v26 }
 0x1d1   : > { %v1180_v33 = vpack.c.bf16 %v724_v31, %v721_v30 }
 0x1d2   : > { %1249 = vst [vmem:[%s1608_s27 + $0x18] sm:$0xff] %v1185_v32  }
 0x1d3   : > { %1248 = vst [vmem:[%s1608_s27 + $0x10] sm:$0xff] %v1180_v33   ;;  %v1369_v34 = vpop.f32.mrb[4].mxu1 }
 0x1d4   : > { %v736_v35 = vpop.f32.mrb[5].mxu1  ;;  %v745_v37 = vadd.f32 %v1369_v34, %v1598_v14 }
 0x1d5   : > { %v1370_v36 = vpop.f32.mrb[6].mxu1  ;;  %v737_v40 = vadd.f32 %v1598_v14, %v736_v35 }
 0x1d6   : > { %v748_v38 = vadd.f32 %v1370_v36, %v1598_v14  ;;  %v739_v39 = vpop.f32.mrb[7].mxu1 }
 0x1d7   : > { %v740_v41 = vadd.f32 %v1598_v14, %v739_v39 }
 0x1d8   : > { %v1195_v42 = vpack.c.bf16 %v748_v38, %v745_v37 }
 0x1d9   : > { %v1190_v43 = vpack.c.bf16 %v740_v41, %v737_v40 }
 0x1da   : > { %1251 = vst [vmem:[%s1608_s27 + $0x28] sm:$0xff] %v1195_v42  }
 0x1db   : > { %1250 = vst [vmem:[%s1608_s27 + $0x20] sm:$0xff] %v1190_v43   ;;  %v1373_v44 = vpop.f32.mrb[8].mxu1 }
 0x1dc   : > { %v752_v45 = vpop.f32.mrb[9].mxu1  ;;  %v761_v47 = vadd.f32 %v1373_v44, %v1598_v14 }
 0x1dd   : > { %v1374_v46 = vpop.f32.mrb[10].mxu1  ;;  %v753_v50 = vadd.f32 %v1598_v14, %v752_v45 }
 0x1de   : > { %v764_v48 = vadd.f32 %v1374_v46, %v1598_v14  ;;  %v755_v49 = vpop.f32.mrb[11].mxu1 }
 0x1df   : > { %v756_v51 = vadd.f32 %v1598_v14, %v755_v49 }
 0x1e0   : > { %v1205_v52 = vpack.c.bf16 %v764_v48, %v761_v47 }
 0x1e1   : > { %v1200_v53 = vpack.c.bf16 %v756_v51, %v753_v50 }
 0x1e2   : > { %1253 = vst [vmem:[%s1608_s27 + $0x38] sm:$0xff] %v1205_v52  }
 0x1e3   : > { %1252 = vst [vmem:[%s1608_s27 + $0x30] sm:$0xff] %v1200_v53   ;;  %v1377_v54 = vpop.f32.mrb[12].mxu1 }
 0x1e4   : > { %v768_v55 = vpop.f32.mrb[13].mxu1  ;;  %v777_v57 = vadd.f32 %v1377_v54, %v1598_v14 }
 0x1e5   : > { %v1378_v56 = vpop.f32.mrb[14].mxu1  ;;  %v769_v60 = vadd.f32 %v1598_v14, %v768_v55 }
 0x1e6   : > { %v780_v58 = vadd.f32 %v1378_v56, %v1598_v14  ;;  %v771_v59 = vpop.f32.mrb[15].mxu1 }
 0x1e7   : > { %v772_v61 = vadd.f32 %v1598_v14, %v771_v59 }
 0x1e8   : > { %v1215_v62 = vpack.c.bf16 %v780_v58, %v777_v57 }
 0x1e9   : > { %v1210_v63 = vpack.c.bf16 %v772_v61, %v769_v60 }
 0x1ea   : > { %1255 = vst [vmem:[%s1608_s27 + $0x48] sm:$0xff] %v1215_v62  }
 0x1eb   : > { %1254 = vst [vmem:[%s1608_s27 + $0x40] sm:$0xff] %v1210_v63   ;;  %v1381_v0 = vpop.f32.mrb[16].mxu1 }
 0x1ec   : > { %v784_v1 = vpop.f32.mrb[17].mxu1  ;;  %v793_v3 = vadd.f32 %v1381_v0, %v1598_v14 }
 0x1ed   : > { %v1382_v2 = vpop.f32.mrb[18].mxu1  ;;  %v785_v6 = vadd.f32 %v1598_v14, %v784_v1 }
 0x1ee   : > { %v796_v4 = vadd.f32 %v1382_v2, %v1598_v14  ;;  %v787_v5 = vpop.f32.mrb[19].mxu1 }
 0x1ef   : > { %v788_v7 = vadd.f32 %v1598_v14, %v787_v5 }
 0x1f0   : > { %v1225_v8 = vpack.c.bf16 %v796_v4, %v793_v3 }
 0x1f1   : > { %v1220_v9 = vpack.c.bf16 %v788_v7, %v785_v6 }
 0x1f2   : > { %1257 = vst [vmem:[%s1608_s27 + $0x58] sm:$0xff] %v1225_v8  }
 0x1f3   : > { %1256 = vst [vmem:[%s1608_s27 + $0x50] sm:$0xff] %v1220_v9   ;;  %v1385_v10 = vpop.f32.mrb[20].mxu1 }
 0x1f4   : > { %v800_v11 = vpop.f32.mrb[21].mxu1  ;;  %v809_v13 = vadd.f32 %v1385_v10, %v1598_v14 }
 0x1f5   : > { %v1386_v12 = vpop.f32.mrb[22].mxu1  ;;  %v801_v17 = vadd.f32 %v1598_v14, %v800_v11 }
 0x1f6   : > { %v812_v15 = vadd.f32 %v1386_v12, %v1598_v14  ;;  %v803_v16 = vpop.f32.mrb[23].mxu1 }
 0x1f7   : > { %v804_v27 = vadd.f32 %v1598_v14, %v803_v16 }
 0x1f8   : > { %v1235_v18 = vpack.c.bf16 %v812_v15, %v809_v13 }
 0x1f9   : > { %v1230_v19 = vpack.c.bf16 %v804_v27, %v801_v17 }
 0x1fa   : > { %1259 = vst [vmem:[%s1608_s27 + $0x68] sm:$0xff] %v1235_v18  }
 0x1fb   : > { %1258 = vst [vmem:[%s1608_s27 + $0x60] sm:$0xff] %v1230_v19   ;;  %v1389_v20 = vpop.f32.mrb[24].mxu1 }
 0x1fc   : > { %v816_v21 = vpop.f32.mrb[25].mxu1  ;;  %v825_v23 = vadd.f32 %v1389_v20, %v1598_v14 }
 0x1fd   : > { %v1390_v22 = vpop.f32.mrb[26].mxu1  ;;  %v817_v26 = vadd.f32 %v1598_v14, %v816_v21 }
 0x1fe   : > { %v828_v24 = vadd.f32 %v1390_v22, %v1598_v14  ;;  %v819_v25 = vpop.f32.mrb[27].mxu1 }
 0x1ff   : > { %v820_v28 = vadd.f32 %v1598_v14, %v819_v25 }
 0x200   : > { %v1245_v29 = vpack.c.bf16 %v828_v24, %v825_v23 }
 0x201   : > { %v1240_v30 = vpack.c.bf16 %v820_v28, %v817_v26 }
 0x202   : > { %1261 = vst [vmem:[%s1608_s27 + $0x78] sm:$0xff] %v1245_v29  }
 0x203   : > { %1260 = vst [vmem:[%s1608_s27 + $0x70] sm:$0xff] %v1240_v30  }
 0x204 PF: > { %s14_s15 = sadd.s32 1, %s1448_s15  }
 0x205   : > { %p11_p4 = scmp.ge.s32.totalorder %s14_s15, 4  }
 0x207   :  { %13 = sbr.rel (!%p11_p4) target bundleno = 1 (0x1), region = 66 }

</bundles_post_ra>
